<compile_context>
chip_gen: v6e
topology: v6e:2x2x1
jax: 0.10.0
libtpu: 0.0.40
codegen_flags: <defaults>
</compile_context>

<pallas_src>
import functools

import jax
import jax.numpy as jnp
from jax.experimental import pallas as pl
from jax.experimental.pallas import tpu as pltpu


# ----------------------------- Pallas kernel ------------------------------ #
def _fast_recip(x):
    # EUP vrcp (free slot) + one Newton-Raphson step -> ~full f32 accuracy.
    r = pl.reciprocal(x, approx=True)
    return r * (2.0 - x * r)


def _gcn_kernel(xt_ref, nxt_ref, awt_ref, abt_ref, ga_ref, gb_ref, gc_ref,
                tht_ref, bt_ref, out_ref, *, lamda, num_neighbors):
    f32 = jnp.float32
    xt = xt_ref[...].astype(f32)                         # (Fin, TB)
    awt = awt_ref[...].astype(f32)                       # (GH, Fin)

    # X @ Aw + Abias, transposed -> (GH, TB)
    x_aw = (jnp.dot(awt, xt, preferred_element_type=f32)
            + abt_ref[...].astype(f32))

    # mu_x = sum_k tanh((X - Nx_k)@Aw + Abias), using X@Aw - Nx_k@Aw.
    # K is small & static -> unrolled; also accumulate sum_k Nx_k on the fly.
    mu_x = jnp.zeros_like(x_aw)                          # (GH, TB)
    nx_sum = jnp.zeros_like(xt)                          # (Fin, TB)
    for k in range(num_neighbors):
        nk = nxt_ref[k].astype(f32)                      # (Fin, TB)
        nx_sum = nx_sum + nk
        n_aw = jnp.dot(awt, nk, preferred_element_type=f32)
        mu_x = mu_x + jnp.tanh(x_aw - n_aw)

    # Gaussian responsibilities via the expanded quadratic: two small matmuls
    # (NF, GH) @ (GH, TB) with host-precomputed constants.
    dif_mu = (jnp.dot(ga_ref[...].astype(f32), mu_x * mu_x,
                      preferred_element_type=f32)
              + jnp.dot(gb_ref[...].astype(f32), mu_x,
                        preferred_element_type=f32)
              + gc_ref[...].astype(f32))                 # (NF, TB)

    wsum = jnp.sum(jnp.exp(dif_mu), axis=0, keepdims=True)        # (1, TB)
    # s = lamda * sum_n (w_n / (1e-14 + sum_n w_n)) = lamda * wsum/(1e-14+wsum)
    s = lamda * wsum * _fast_recip(1e-14 + wsum)                  # (1, TB)

    # bmm(weight, repeat(Nx_sum)) collapses to s * Nx_sum.
    h = (s * nx_sum + xt) * _fast_recip(1.0 + s)                  # (Fin, TB)

    out = (jnp.dot(tht_ref[...].astype(f32), h, preferred_element_type=f32)
           + bt_ref[...].astype(f32))                             # (Fout, TB)
    out_ref[...] = jnp.maximum(out, 0.0).astype(out_ref.dtype)


# ------------------------------ host wrapper ------------------------------ #
def gcn_layer_pallas(X, Nx, params, *, lamda=0.1, tile_b=512):
    B, Fin = X.shape
    _, K, _ = Nx.shape
    aw, ab, mu, sig, theta, bias = (params["Aweight"], params["Abias"],
                                    params["mu"], params["sigma"],
                                    params["theta"], params["bias"])
    NF, GH = mu.shape
    Fout = theta.shape[1]
    f32 = jnp.float32

    # Lane-dense batch tiling: tile_b is a multiple of 128, batch is padded.
    tile_b = max(128, (int(tile_b) // 128) * 128)
    tile_b = min(tile_b, ((B + 127) // 128) * 128)
    n_tiles = (B + tile_b - 1) // tile_b
    Bp = n_tiles * tile_b

    # Transpose so the batch sits on the lane axis; pad batch with zeros.
    xt = jnp.pad(X.T, ((0, 0), (0, Bp - B)))                         # (Fin, Bp)
    nxt = jnp.pad(jnp.transpose(Nx, (1, 2, 0)),
                  ((0, 0), (0, 0), (0, Bp - B)))                     # (K, Fin, Bp)

    # Host-precomputed (tiny) parameter matrices.
    awt = aw.T.astype(f32)                                           # (GH, Fin)
    abt = ab.T.astype(f32)                                           # (GH, 1)
    inv_sig2 = 1.0 / (1e-14 + sig.astype(f32) * sig.astype(f32))     # (NF, GH)
    g_a = -0.5 * inv_sig2                                            # (NF, GH)
    g_b = mu.astype(f32) * inv_sig2                                  # (NF, GH)
    g_c = -0.5 * jnp.sum(mu.astype(f32) ** 2 * inv_sig2,
                         axis=1, keepdims=True)                      # (NF, 1)
    tht = theta.T.astype(f32)                                        # (Fout, Fin)
    bt = bias.T.astype(f32)                                          # (Fout, 1)

    kernel = functools.partial(_gcn_kernel, lamda=lamda, num_neighbors=K)

    def full_spec(shape):
        return pl.BlockSpec(shape, lambda i: (0,) * len(shape))

    out_t = pl.pallas_call(
        kernel,
        out_shape=jax.ShapeDtypeStruct((Fout, Bp), X.dtype),
        grid_spec=pltpu.PrefetchScalarGridSpec(
            num_scalar_prefetch=0,
            grid=(n_tiles,),
            in_specs=[
                pl.BlockSpec((Fin, tile_b), lambda i: (0, i)),        # X^T
                pl.BlockSpec((K, Fin, tile_b), lambda i: (0, 0, i)),  # Nx^T
                full_spec((GH, Fin)),                                 # Aweight^T
                full_spec((GH, 1)),                                   # Abias^T
                full_spec((NF, GH)),                                  # gA
                full_spec((NF, GH)),                                  # gB
                full_spec((NF, 1)),                                   # gc
                full_spec((Fout, Fin)),                               # theta^T
                full_spec((Fout, 1)),                                 # bias^T
            ],
            out_specs=pl.BlockSpec((Fout, tile_b), lambda i: (0, i)),
        ),
        compiler_params=pltpu.CompilerParams(
            dimension_semantics=("parallel",),
            vmem_limit_bytes=32 * 1024 * 1024),
    )(xt, nxt, awt, abt, g_a, g_b, g_c, tht, bt)

    return out_t.T[:B]


# ----------------------------- JAX reference ------------------------------ #
def gcn_layer_ref(X, Nx, params, *, lamda=0.1):
    aw, ab, mu, sig, theta, bias = (params["Aweight"], params["Abias"],
                                    params["mu"], params["sigma"],
                                    params["theta"], params["bias"])
    dif = X[:, None, :] - Nx                                         # (B, K, Fin)
    mu_x = jnp.tanh(jnp.einsum("bkf,fg->bkg", dif, aw) + ab)
    mu_x = jnp.sum(mu_x, axis=1)                                     # (B, GH)
    d = mu_x[:, None, :] - mu[None]
    dif_mu = jnp.sum(-0.5 * d * d / (1e-14 + sig * sig)[None], axis=-1)
    w = jnp.exp(dif_mu)
    w = w / (1e-14 + jnp.sum(w, axis=-1, keepdims=True))
    w = lamda * w
    s = jnp.sum(w, axis=-1, keepdims=True)
    x_merge = s * jnp.sum(Nx, axis=1)
    h = (x_merge + X) / (1.0 + s)
    return jax.nn.relu(h @ theta + bias)


# ----------------------------- parameter init ----------------------------- #
def xavier_uniform(key, shape):
    # torch.nn.init.xavier_uniform_ for 2-D: fan_in = shape[1], fan_out = shape[0]
    fan_in, fan_out = shape[1], shape[0]
    bound = (6.0 / (fan_in + fan_out)) ** 0.5
    return jax.random.uniform(key, shape, jnp.float32, -bound, bound)


def _check(out, ref, tag):
    if not jnp.allclose(out, ref, atol=5e-4, rtol=5e-4):
        err = float(jnp.max(jnp.abs(out - ref)))
        raise AssertionError(f"{tag}: Pallas/JAX mismatch, max abs err {err}")


if __name__ == "__main__":
    # Module hyper-parameters (match GCNlayer defaults).
    num_gaussian, gh, ifeat, ofeat, lamda = 6, 3, 10, 10, 0.1
    B, K = 16, 4                                  # batch, neighbors

    key = jax.random.PRNGKey(0)
    k_mu, k_sig, k_aw, k_th, k_x, k_nx, k_x2, k_nx2 = jax.random.split(key, 8)

    params = {
        "mu": xavier_uniform(k_mu, (num_gaussian, gh)),
        "sigma": xavier_uniform(k_sig, (num_gaussian, gh)),
        "Aweight": xavier_uniform(k_aw, (ifeat, gh)),
        "theta": xavier_uniform(k_th, (ifeat, ofeat)),
        "Abias": jnp.zeros((1, gh), jnp.float32),     # torch init: zeros
        "bias": jnp.zeros((1, ofeat), jnp.float32),   # torch init: zeros
    }

    # Small test (single 128-wide lane tile, padded batch).
    X = jax.random.normal(k_x, (B, ifeat), jnp.float32)
    Nx = jax.random.normal(k_nx, (B, K, ifeat), jnp.float32)
    out = jax.block_until_ready(gcn_layer_pallas(X, Nx, params, lamda=lamda))
    assert out.shape == (B, ofeat), out.shape
    _check(out, gcn_layer_ref(X, Nx, params, lamda=lamda), "B=16")

    # Multi-tile test (non-divisible batch -> cdiv grid + padding, grid=3).
    B2 = 300
    X2 = jax.random.normal(k_x2, (B2, ifeat), jnp.float32)
    Nx2 = jax.random.normal(k_nx2, (B2, K, ifeat), jnp.float32)
    out2 = jax.block_until_ready(
        gcn_layer_pallas(X2, Nx2, params, lamda=lamda, tile_b=128))
    assert out2.shape == (B2, ofeat), out2.shape
    _check(out2, gcn_layer_ref(X2, Nx2, params, lamda=lamda), "B=300")

    print("KERNEL_OK")
</pallas_src>

<mosaic_0001>
module attributes {stable_mosaic.version = 11 : i64} {
  func.func @_gcn_kernel(%arg0: i32, %arg1: memref<10x128xf32, #tpu.memory_space<vmem>>, %arg2: memref<4x10x128xf32, #tpu.memory_space<vmem>>, %arg3: memref<3x10xf32, #tpu.memory_space<vmem>>, %arg4: memref<3x1xf32, #tpu.memory_space<vmem>>, %arg5: memref<6x3xf32, #tpu.memory_space<vmem>>, %arg6: memref<6x3xf32, #tpu.memory_space<vmem>>, %arg7: memref<6x1xf32, #tpu.memory_space<vmem>>, %arg8: memref<10x10xf32, #tpu.memory_space<vmem>>, %arg9: memref<10x1xf32, #tpu.memory_space<vmem>>, %arg10: memref<10x128xf32, #tpu.memory_space<vmem>>) attributes {dimension_semantics = [#tpu.dimension_semantics<parallel>], iteration_bounds = array<i64: 1>, scalar_prefetch = 0 : i64, scratch_operands = 0 : i64, tpu.core_type = #tpu.core_type<tc>, window_params = [{transform_indices = @transform_0, window_bounds = array<i64: 10, 128>}, {transform_indices = @transform_1, window_bounds = array<i64: 4, 10, 128>}, {pipeline_mode = #tpu.pipeline_mode<synchronous>, transform_indices = @transform_2, window_bounds = array<i64: 3, 10>}, {pipeline_mode = #tpu.pipeline_mode<synchronous>, transform_indices = @transform_3, window_bounds = array<i64: 3, 1>}, {pipeline_mode = #tpu.pipeline_mode<synchronous>, transform_indices = @transform_4, window_bounds = array<i64: 6, 3>}, {pipeline_mode = #tpu.pipeline_mode<synchronous>, transform_indices = @transform_5, window_bounds = array<i64: 6, 3>}, {pipeline_mode = #tpu.pipeline_mode<synchronous>, transform_indices = @transform_6, window_bounds = array<i64: 6, 1>}, {pipeline_mode = #tpu.pipeline_mode<synchronous>, transform_indices = @transform_7, window_bounds = array<i64: 10, 10>}, {pipeline_mode = #tpu.pipeline_mode<synchronous>, transform_indices = @transform_8, window_bounds = array<i64: 10, 1>}, {transform_indices = @transform_9, window_bounds = array<i64: 10, 128>}]} {
    %c0 = arith.constant 0 : index
    %c0_0 = arith.constant 0 : index
    %0 = vector.load %arg1[%c0, %c0_0] : memref<10x128xf32, #tpu.memory_space<vmem>>, vector<10x128xf32>
    %c0_1 = arith.constant 0 : index
    %c0_2 = arith.constant 0 : index
    %1 = vector.load %arg3[%c0_1, %c0_2] : memref<3x10xf32, #tpu.memory_space<vmem>>, vector<3x10xf32>
    %cst = arith.constant dense<0.000000e+00> : vector<3x128xf32>
    %2 = tpu.matmul %1, %0, %cst {dimension_numbers = #tpu.dot_dimension_numbers<[1], [0], [0], [1], [0, 0, 1, 1], [], []>} : vector<3x10xf32>, vector<10x128xf32>, vector<3x128xf32> -> vector<3x128xf32>
    %c0_3 = arith.constant 0 : index
    %c0_4 = arith.constant 0 : index
    %3 = vector.load %arg4[%c0_3, %c0_4] : memref<3x1xf32, #tpu.memory_space<vmem>>, vector<3x1xf32>
    %4 = vector.broadcast %3 : vector<3x1xf32> to vector<3x128xf32>
    %5 = arith.addf %2, %4 : vector<3x128xf32>
    %cst_5 = arith.constant 0.000000e+00 : f32
    %6 = vector.broadcast %cst_5 : f32 to vector<3x128xf32>
    %cst_6 = arith.constant 0.000000e+00 : f32
    %7 = vector.broadcast %cst_6 : f32 to vector<10x128xf32>
    %c0_7 = arith.constant 0 : index
    %c0_8 = arith.constant 0 : index
    %c0_9 = arith.constant 0 : index
    %8 = vector.load %arg2[%c0_7, %c0_8, %c0_9] : memref<4x10x128xf32, #tpu.memory_space<vmem>>, vector<1x10x128xf32>
    %9 = vector.shape_cast %8 : vector<1x10x128xf32> to vector<10x128xf32>
    %10 = arith.addf %7, %9 : vector<10x128xf32>
    %cst_10 = arith.constant dense<0.000000e+00> : vector<3x128xf32>
    %11 = tpu.matmul %1, %9, %cst_10 {dimension_numbers = #tpu.dot_dimension_numbers<[1], [0], [0], [1], [0, 0, 1, 1], [], []>} : vector<3x10xf32>, vector<10x128xf32>, vector<3x128xf32> -> vector<3x128xf32>
    %12 = arith.subf %5, %11 : vector<3x128xf32>
    %13 = math.tanh %12 : vector<3x128xf32>
    %14 = arith.addf %6, %13 : vector<3x128xf32>
    %c1 = arith.constant 1 : index
    %c0_11 = arith.constant 0 : index
    %c0_12 = arith.constant 0 : index
    %15 = vector.load %arg2[%c1, %c0_11, %c0_12] : memref<4x10x128xf32, #tpu.memory_space<vmem>>, vector<1x10x128xf32>
    %16 = vector.shape_cast %15 : vector<1x10x128xf32> to vector<10x128xf32>
    %17 = arith.addf %10, %16 : vector<10x128xf32>
    %cst_13 = arith.constant dense<0.000000e+00> : vector<3x128xf32>
    %18 = tpu.matmul %1, %16, %cst_13 {dimension_numbers = #tpu.dot_dimension_numbers<[1], [0], [0], [1], [0, 0, 1, 1], [], []>} : vector<3x10xf32>, vector<10x128xf32>, vector<3x128xf32> -> vector<3x128xf32>
    %19 = arith.subf %5, %18 : vector<3x128xf32>
    %20 = math.tanh %19 : vector<3x128xf32>
    %21 = arith.addf %14, %20 : vector<3x128xf32>
    %c2 = arith.constant 2 : index
    %c0_14 = arith.constant 0 : index
    %c0_15 = arith.constant 0 : index
    %22 = vector.load %arg2[%c2, %c0_14, %c0_15] : memref<4x10x128xf32, #tpu.memory_space<vmem>>, vector<1x10x128xf32>
    %23 = vector.shape_cast %22 : vector<1x10x128xf32> to vector<10x128xf32>
    %24 = arith.addf %17, %23 : vector<10x128xf32>
    %cst_16 = arith.constant dense<0.000000e+00> : vector<3x128xf32>
    %25 = tpu.matmul %1, %23, %cst_16 {dimension_numbers = #tpu.dot_dimension_numbers<[1], [0], [0], [1], [0, 0, 1, 1], [], []>} : vector<3x10xf32>, vector<10x128xf32>, vector<3x128xf32> -> vector<3x128xf32>
    %26 = arith.subf %5, %25 : vector<3x128xf32>
    %27 = math.tanh %26 : vector<3x128xf32>
    %28 = arith.addf %21, %27 : vector<3x128xf32>
    %c3 = arith.constant 3 : index
    %c0_17 = arith.constant 0 : index
    %c0_18 = arith.constant 0 : index
    %29 = vector.load %arg2[%c3, %c0_17, %c0_18] : memref<4x10x128xf32, #tpu.memory_space<vmem>>, vector<1x10x128xf32>
    %30 = vector.shape_cast %29 : vector<1x10x128xf32> to vector<10x128xf32>
    %31 = arith.addf %24, %30 : vector<10x128xf32>
    %cst_19 = arith.constant dense<0.000000e+00> : vector<3x128xf32>
    %32 = tpu.matmul %1, %30, %cst_19 {dimension_numbers = #tpu.dot_dimension_numbers<[1], [0], [0], [1], [0, 0, 1, 1], [], []>} : vector<3x10xf32>, vector<10x128xf32>, vector<3x128xf32> -> vector<3x128xf32>
    %33 = arith.subf %5, %32 : vector<3x128xf32>
    %34 = math.tanh %33 : vector<3x128xf32>
    %35 = arith.addf %28, %34 : vector<3x128xf32>
    %c0_20 = arith.constant 0 : index
    %c0_21 = arith.constant 0 : index
    %36 = vector.load %arg5[%c0_20, %c0_21] : memref<6x3xf32, #tpu.memory_space<vmem>>, vector<6x3xf32>
    %37 = arith.mulf %35, %35 : vector<3x128xf32>
    %cst_22 = arith.constant dense<0.000000e+00> : vector<6x128xf32>
    %38 = tpu.matmul %36, %37, %cst_22 {dimension_numbers = #tpu.dot_dimension_numbers<[1], [0], [0], [1], [0, 0, 1, 1], [], []>} : vector<6x3xf32>, vector<3x128xf32>, vector<6x128xf32> -> vector<6x128xf32>
    %c0_23 = arith.constant 0 : index
    %c0_24 = arith.constant 0 : index
    %39 = vector.load %arg6[%c0_23, %c0_24] : memref<6x3xf32, #tpu.memory_space<vmem>>, vector<6x3xf32>
    %cst_25 = arith.constant dense<0.000000e+00> : vector<6x128xf32>
    %40 = tpu.matmul %39, %35, %cst_25 {dimension_numbers = #tpu.dot_dimension_numbers<[1], [0], [0], [1], [0, 0, 1, 1], [], []>} : vector<6x3xf32>, vector<3x128xf32>, vector<6x128xf32> -> vector<6x128xf32>
    %41 = arith.addf %38, %40 : vector<6x128xf32>
    %c0_26 = arith.constant 0 : index
    %c0_27 = arith.constant 0 : index
    %42 = vector.load %arg7[%c0_26, %c0_27] : memref<6x1xf32, #tpu.memory_space<vmem>>, vector<6x1xf32>
    %43 = vector.broadcast %42 : vector<6x1xf32> to vector<6x128xf32>
    %44 = arith.addf %41, %43 : vector<6x128xf32>
    %45 = math.exp %44 : vector<6x128xf32>
    %cst_28 = arith.constant dense<0.000000e+00> : vector<128xf32>
    %46 = vector.multi_reduction <add>, %45, %cst_28 [0] : vector<6x128xf32> to vector<128xf32>
    %47 = vector.shape_cast %46 : vector<128xf32> to vector<1x128xf32>
    %cst_29 = arith.constant 1.000000e-01 : f32
    %48 = vector.broadcast %cst_29 : f32 to vector<1x128xf32>
    %49 = arith.mulf %48, %47 : vector<1x128xf32>
    %cst_30 = arith.constant 9.99999982E-15 : f32
    %50 = vector.broadcast %cst_30 : f32 to vector<1x128xf32>
    %51 = arith.addf %50, %47 : vector<1x128xf32>
    %52 = tpu.reciprocal %51 {approx = true} : vector<1x128xf32> -> vector<1x128xf32>
    %53 = arith.mulf %51, %52 : vector<1x128xf32>
    %cst_31 = arith.constant 2.000000e+00 : f32
    %54 = vector.broadcast %cst_31 : f32 to vector<1x128xf32>
    %55 = arith.subf %54, %53 : vector<1x128xf32>
    %56 = arith.mulf %52, %55 : vector<1x128xf32>
    %57 = arith.mulf %49, %56 : vector<1x128xf32>
    %58 = vector.broadcast %57 : vector<1x128xf32> to vector<10x128xf32>
    %59 = arith.mulf %58, %31 : vector<10x128xf32>
    %60 = arith.addf %59, %0 : vector<10x128xf32>
    %cst_32 = arith.constant 1.000000e+00 : f32
    %61 = vector.broadcast %cst_32 : f32 to vector<1x128xf32>
    %62 = arith.addf %61, %57 : vector<1x128xf32>
    %63 = tpu.reciprocal %62 {approx = true} : vector<1x128xf32> -> vector<1x128xf32>
    %64 = arith.mulf %62, %63 : vector<1x128xf32>
    %cst_33 = arith.constant 2.000000e+00 : f32
    %65 = vector.broadcast %cst_33 : f32 to vector<1x128xf32>
    %66 = arith.subf %65, %64 : vector<1x128xf32>
    %67 = arith.mulf %63, %66 : vector<1x128xf32>
    %68 = vector.broadcast %67 : vector<1x128xf32> to vector<10x128xf32>
    %69 = arith.mulf %60, %68 : vector<10x128xf32>
    %c0_34 = arith.constant 0 : index
    %c0_35 = arith.constant 0 : index
    %70 = vector.load %arg8[%c0_34, %c0_35] : memref<10x10xf32, #tpu.memory_space<vmem>>, vector<10x10xf32>
    %cst_36 = arith.constant dense<0.000000e+00> : vector<10x128xf32>
    %71 = tpu.matmul %70, %69, %cst_36 {dimension_numbers = #tpu.dot_dimension_numbers<[1], [0], [0], [1], [0, 0, 1, 1], [], []>} : vector<10x10xf32>, vector<10x128xf32>, vector<10x128xf32> -> vector<10x128xf32>
    %c0_37 = arith.constant 0 : index
    %c0_38 = arith.constant 0 : index
    %72 = vector.load %arg9[%c0_37, %c0_38] : memref<10x1xf32, #tpu.memory_space<vmem>>, vector<10x1xf32>
    %73 = vector.broadcast %72 : vector<10x1xf32> to vector<10x128xf32>
    %74 = arith.addf %71, %73 : vector<10x128xf32>
    %cst_39 = arith.constant 0.000000e+00 : f32
    %75 = vector.broadcast %cst_39 : f32 to vector<10x128xf32>
    %76 = arith.maximumf %74, %75 : vector<10x128xf32>
    %c0_40 = arith.constant 0 : index
    %c0_41 = arith.constant 0 : index
    %77 = vector.load %arg10[%c0_40, %c0_41] : memref<10x128xf32, #tpu.memory_space<vmem>>, vector<10x128xf32>
    tpu.vector_store %arg10[%c0_40, %c0_41], %76 {strides = array<i32>} : memref<10x128xf32, #tpu.memory_space<vmem>>, vector<10x128xf32>,
    return
  }
  func.func @transform_0(%arg0: i32) -> (i32, i32) {
    %c0_i32 = arith.constant 0 : i32
    %c0_i32_0 = arith.constant 0 : i32
    return %c0_i32, %arg0 : i32, i32
  }
  func.func @transform_1(%arg0: i32) -> (i32, i32, i32) {
    %c0_i32 = arith.constant 0 : i32
    %c0_i32_0 = arith.constant 0 : i32
    %c0_i32_1 = arith.constant 0 : i32
    return %c0_i32, %c0_i32_0, %arg0 : i32, i32, i32
  }
  func.func @transform_2(%arg0: i32) -> (i32, i32) {
    %c0_i32 = arith.constant 0 : i32
    %c0_i32_0 = arith.constant 0 : i32
    %c0_i32_1 = arith.constant 0 : i32
    return %c0_i32, %c0_i32_0 : i32, i32
  }
  func.func @transform_3(%arg0: i32) -> (i32, i32) {
    %c0_i32 = arith.constant 0 : i32
    %c0_i32_0 = arith.constant 0 : i32
    %c0_i32_1 = arith.constant 0 : i32
    return %c0_i32, %c0_i32_0 : i32, i32
  }
  func.func @transform_4(%arg0: i32) -> (i32, i32) {
    %c0_i32 = arith.constant 0 : i32
    %c0_i32_0 = arith.constant 0 : i32
    %c0_i32_1 = arith.constant 0 : i32
    return %c0_i32, %c0_i32_0 : i32, i32
  }
  func.func @transform_5(%arg0: i32) -> (i32, i32) {
    %c0_i32 = arith.constant 0 : i32
    %c0_i32_0 = arith.constant 0 : i32
    %c0_i32_1 = arith.constant 0 : i32
    return %c0_i32, %c0_i32_0 : i32, i32
  }
  func.func @transform_6(%arg0: i32) -> (i32, i32) {
    %c0_i32 = arith.constant 0 : i32
    %c0_i32_0 = arith.constant 0 : i32
    %c0_i32_1 = arith.constant 0 : i32
    return %c0_i32, %c0_i32_0 : i32, i32
  }
  func.func @transform_7(%arg0: i32) -> (i32, i32) {
    %c0_i32 = arith.constant 0 : i32
    %c0_i32_0 = arith.constant 0 : i32
    %c0_i32_1 = arith.constant 0 : i32
    return %c0_i32, %c0_i32_0 : i32, i32
  }
  func.func @transform_8(%arg0: i32) -> (i32, i32) {
    %c0_i32 = arith.constant 0 : i32
    %c0_i32_0 = arith.constant 0 : i32
    %c0_i32_1 = arith.constant 0 : i32
    return %c0_i32, %c0_i32_0 : i32, i32
  }
  func.func @transform_9(%arg0: i32) -> (i32, i32) {
    %c0_i32 = arith.constant 0 : i32
    %c0_i32_0 = arith.constant 0 : i32
    return %c0_i32, %arg0 : i32, i32
  }
}

</mosaic_0001>

<bundles_post_ra>
// kernel: tpu_custom_call.1
= control target key start
LH: loop header
LB: loop body
LE: loop exit
PB: predicated region body
PF: predicated region fallthrough
CT: control target
= control target key end

     0   :  { %vm46_vm0 = vcmask 1041408   ;;  %v895_v2 = vmov 0.0   ;;  %vm42_vm1 = vcmask 80896   ;;  %vm896_vm2 = vmmov 0   ;;  %s1046_s0 = inlined_call_operand.vmem [shape: f32[10,128], index: 0, kind: input, shape index: {}]   ;;  %s1047_s1 = inlined_call_operand.vmem [shape: f32[4,10,128], index: 1, kind: input, shape index: {}]   ;;  %s1048_s2 = inlined_call_operand.vmem [shape: f32[3,10], index: 2, kind: input, shape index: {}]   ;;  %s1049_s3 = inlined_call_operand.vmem [shape: f32[3,1], index: 3, kind: input, shape index: {}]   ;;  %s1050_s4 = inlined_call_operand.vmem [shape: f32[6,3], index: 4, kind: input, shape index: {}]   ;;  %s1051_s5 = inlined_call_operand.vmem [shape: f32[6,3], index: 5, kind: input, shape index: {}]   ;;  %s1052_s6 = inlined_call_operand.vmem [shape: f32[6,1], index: 6, kind: input, shape index: {}]   ;;  %s1053_s7 = inlined_call_operand.vmem [shape: f32[10,10], index: 7, kind: input, shape index: {}]   ;;  %s1054_s8 = inlined_call_operand.vmem [shape: f32[10,1], index: 8, kind: input, shape index: {}]   ;;  %s1055_s9 = inlined_call_operand.hbm [shape: f32[10,128], index: 9, kind: output, shape index: {}]  }
   0x1   :  { %v954_v0 = vld [vmem:[%s1046_s0 + $0x8] sm:$0x3]  ;;  %799 = vmatprep.subr.mxu0 %v895_v2  ;;  %806 = vmatprep.subr.mxu1 %v895_v2  ;;  %v758_v3 = vld [vmem:[%s1047_s1 + $0x18] sm:$0x3]  ;;  %v965_v4 = vld [vmem:[%s1046_s0] sm:$0xff] }
   0x2   :  { %v121_v1 = vld [vmem:[%s1047_s1 + $0x8] sm:$0x3]  ;;  %800 = vmatpush3.msk.msra.mxu0 %vm46_vm0, %v954_v0  ;;  %v120_v6 = vld [vmem:[%s1047_s1] sm:$0xff]  ;;  %v757_v7 = vld [vmem:[%s1047_s1 + $0x10] sm:$0xff]  ;;  %803 = vmatprep.mubr.msk.f32.mxu0 %vm896_vm2, %v895_v2 }
   0x3   :  { %807 = vmatpush3.msk.msra.mxu1 %vm46_vm0, %v121_v1  ;;  %v204_v5 = vadd.f32 %v758_v3, %v121_v1  ;;  %v762_v8 = vld [vmem:[%s1047_s1 + $0x28] sm:$0x3]  ;;  %801 = vmatprep.subr.mxu0 %v895_v2  ;;  %v203_v9 = vadd.f32 %v757_v7, %v120_v6  ;;  %v35_v10 = vld [vmem:[%s1048_s2] sm:$0x7] }
   0x4   :  { %808 = vmatprep.subr.mxu1 %v895_v2  ;;  %802 = vmatpush3.msra.mxu0 %v965_v4  ;;  %v761_v12 = vld [vmem:[%s1047_s1 + $0x20] sm:$0xff] }
   0x5   :  { %v285_v11 = vadd.f32 %v762_v8, %v204_v5 }
   0x6   :  { %14 = vsyncpa [#allocation3], 0  ;;  %809 = vmatpush3.msra.mxu1 %v120_v6  ;;  %810 = vmatprep.mubr.msk.f32.mxu1 %vm896_vm2, %v895_v2  ;;  %v284_v13 = vadd.f32 %v761_v12, %v203_v9  ;;  %v766_v14 = vld [vmem:[%s1047_s1 + $0x38] sm:$0x3]  ;;  %v765_v16 = vld [vmem:[%s1047_s1 + $0x30] sm:$0xff]  ;;  %v897_v19 = vmov 0  }
   0x7   :  { %804 = vmatmul.mubr.msk.f32.vlgmr.msra.gmra.mxu0 %vm42_vm1, %v35_v10  ;;  %811 = vmatmul.mubr.msk.f32.vlgmr.msra.gmra.mxu1 %vm42_vm1, %v35_v10  ;;  %v993_v15 = vadd.f32 %v766_v14, %v285_v11  ;;  %v36_v18 = vld [vmem:[%s1049_s3] sm:$0x7]  ;;  %vm450_vm3 = vcmask 1042432   ;;  %vm446_vm4 = vcmask 23552   ;;  %v638_v49 = vld [vmem:[%s1054_s8 + $0x8] sm:$0x3] }
   0x8   :  { %813 = vmatprep.subr.mxu0 %v895_v2  ;;  %820 = vmatprep.subr.mxu1 %v895_v2  ;;  %v998_v17 = vadd.f32 %v765_v16, %v284_v13  ;;  %v600_v20 = vld [vmem:[%s1052_s6] sm:$0x3f]  ;;  %vm609_vm5 = vcmask 1045504   ;;  %s898_s18 = smov [#allocation2]  }
   0x9   :  { %814 = vmatpush3.msk.msra.mxu0 %vm46_vm0, %v758_v3  ;;  %821 = vmatpush3.msk.msra.mxu1 %vm46_vm0, %v762_v8  ;;  %v445_v44 = vld [vmem:[%s1051_s5] sm:$0x3f]  ;;  %s742_s19 = sshll.u32 %s898_s18, 4  ;;  %s743_s19 = int_to_ptr.vmem [resolvable:$true] %s742_s19 }
   0xa   :  { %815 = vmatprep.subr.mxu0 %v895_v2  ;;  %822 = vmatprep.subr.mxu1 %v895_v2  ;;  %v443_v46 = vld [vmem:[%s1050_s4] sm:$0x3f]  ;;  %s873_s20 = scalar_lea.vmem %s743_s19, 256  ;;  %p878_p1 = scmp.lt.s32.totalorder %s743_s19, %s743_s19 }
   0xb   :  { %816 = vmatpush3.msra.mxu0 %v757_v7  ;;  %817 = vmatprep.mubr.msk.f32.mxu0 %vm896_vm2, %v895_v2  ;;  %v635_v47 = vld [vmem:[%s1053_s7] sm:$0xff]  ;;  %p874_p0 = scmp.ne.s32.totalorder %s743_s19, %s873_s20  ;;  %p879_p2 = scmp.lt.s32.totalorder %s873_s20, %s873_s20 }
   0xc   :  { %823 = vmatpush3.msra.mxu1 %v761_v12  ;;  %824 = vmatprep.mubr.msk.f32.mxu1 %vm896_vm2, %v895_v2  ;;  %v637_v48 = vld [vmem:[%s1054_s8] sm:$0xff] }
   0xd   :  { %818 = vmatmul.mubr.msk.f32.vlgmr.msra.gmra.mxu0 %vm42_vm1, %v35_v10  ;;  %825 = vmatmul.mubr.msk.f32.vlgmr.msra.gmra.mxu1 %vm42_vm1, %v35_v10  ;;  %p880_p3 = por %p879_p2, %p878_p1 }
   0xe   :  { %827 = vmatprep.subr.mxu0 %v895_v2  ;;  %831 = vmatprep.mubr.msk.f32.mxu0 %vm896_vm2, %v895_v2 }
   0xf   :  { %828 = vmatpush3.msk.msra.mxu0 %vm46_vm0, %v766_v14  ;;  %857 = vset.pattern.permute.xlu0 %v897_v19  ;;  %p881_p4 = pnand %p880_p3, %p874_p0 }
  0x10   :  { %829 = vmatprep.subr.mxu0 %v895_v2  ;;  %39 = vperm.xlu0 %857, %v36_v18  }
  0x11   :  { %830 = vmatpush3.msra.mxu0 %v765_v16  ;;  %834 = vmatprep.subr.mxu1 %v895_v2 }
  0x12   :  { %832 = vmatmul.mubr.msk.f32.vlgmr.msra.gmra.mxu0 %vm42_vm1, %v35_v10  ;;  %839 = vmatprep.subr.mxu0 %v895_v2 }
  0x13   :  { %836 = vmatprep.mubr.msk.f32.mxu1 %vm896_vm2, %v895_v2  ;;  %841 = vmatprep.mubr.msk.f32.mxu0 %vm896_vm2, %v895_v2 }
  0x14   :  { %603 = vperm.xlu0 %857, %v600_v20   ;;  %858 = vset.pattern.permute.xlu1 %v897_v19 }
  0x15   :  { %641 = vperm.xlu1 %858, %v637_v48  }
  0x19   :  { %646 = vperm.xlu1 %858, %v638_v49  }
  0x8b   :  { %v40_v21 = vpop.permute.xlu0 %39 }
  0x8f   :  { %v604_v54 = vpop.permute.xlu0 %603 }
  0xc7   :  { %v116_v22 = vpop.f32.mrf.mxu0  ;;  %v193_v23 = vpop.f32.mrf.mxu1 }
  0xc8   :  { %v117_v24 = vadd.f32 %v116_v22, %v40_v21 }
  0xc9   :  { %v805_v25 = vpop.f32.mrf.mxu0  ;;  %v812_v26 = vpop.f32.mrf.mxu1 }
  0xca   :  { %v197_v27 = vsub.f32 %v117_v24, %v193_v23 }
  0xcc   :  { %859 = vtanh.f32 %v197_v27 }
  0xcd   :  { %v274_v28 = vpop.f32.mrf.mxu0  ;;  %v355_v29 = vpop.f32.mrf.mxu1 }
  0xce   :  { %v278_v30 = vsub.f32 %v117_v24, %v274_v28  ;;  %v359_v31 = vsub.f32 %v117_v24, %v355_v29 }
  0xcf   :  { %v819_v32 = vpop.f32.mrf.mxu0  ;;  %v826_v33 = vpop.f32.mrf.mxu1 }
  0xd0   :  { %861 = vtanh.f32 %v278_v30 }
  0xd1   :  { %863 = vtanh.f32 %v359_v31 }
  0xd2   :  { %v436_v34 = vpop.f32.mrf.mxu0 }
  0xd3   :  { %v440_v35 = vsub.f32 %v117_v24, %v436_v34  ;;  %v636_v24 = vld [vmem:[%s1053_s7 + $0x8] sm:$0x3] }
  0xd4   :  { %v833_v36 = vpop.f32.mrf.mxu0 }
  0xd5   :  { %865 = vtanh.f32 %v440_v35 }
  0xd9   :  { %v860_v37 = vpop.eup %859 }
  0xdd   :  { %v862_v38 = vpop.eup %861 }
  0xde   :  { %v280_v39 = vadd.f32 %v862_v38, %v860_v37  ;;  %v864_v40 = vpop.eup %863 }
  0xe0   :  { %v361_v41 = vadd.f32 %v864_v40, %v280_v39 }
  0xe2   :  { %v866_v42 = vpop.eup %865 }
  0xe3   :  { %v442_v43 = vadd.f32 %v866_v42, %v361_v41 }
  0xe5   :  { %835 = vmatpush3.msk.msra.mxu1 %vm450_vm3, %v442_v43  ;;  %v444_v45 = vmul.f32 %v442_v43, %v442_v43 }
  0xe6   :  { %837 = vmatmul.mubr.msk.f32.vlgmr.msra.gmra.mxu1 %vm446_vm4, %v445_v44 }
  0xe7   :  { %840 = vmatpush3.msk.msra.mxu0 %vm450_vm3, %v444_v45  ;;  %848 = vmatprep.mubr.msk.f32.mxu1 %vm42_vm1, %v635_v47 }
  0xe8   :  { %842 = vmatmul.mubr.msk.f32.vlgmr.msra.gmra.mxu0 %vm446_vm4, %v443_v46 }
 0x1a6   :  { %v520_v50 = vpop.f32.mrf.mxu1 }
 0x1a8   :  { %v596_v51 = vpop.f32.mrf.mxu0  ;;  %v838_v52 = vpop.f32.mrf.mxu1 }
 0x1a9   :  { %v597_v53 = vadd.f32 %v596_v51, %v520_v50 }
 0x1aa   :  { %v843_v55 = vpop.f32.mrf.mxu0 }
 0x1ab   :  { %v606_v56 = vadd.f32 %v604_v54, %v597_v53 }
 0x1ad   :  { %v607_v57 = vmul.f32 1.442695, %v606_v56 }
 0x1af   :  { %867 = vpow2.f32 %v607_v57 }
 0x1bc   :  { %v868_v58 = vpop.eup %867 }
 0x1bd   :  { %v610_v59 = vsel %vm609_vm5, %v868_v58, 0.0 }
 0x1be   :  { %v611_v60 = vrot.slane %v610_v59, 4 }
 0x1c0   :  { %v612_v61 = vadd.f32 %v611_v60, %v610_v59 }
 0x1c2   :  { %v613_v62 = vrot.slane %v612_v61, 2 }
 0x1c4   :  { %v614_v63 = vadd.f32 %v613_v62, %v612_v61 }
 0x1c6   :  { %v615_v1 = vrot.slane %v614_v63, 1 }
 0x1c8   :  { %v616_v2 = vadd.f32 %v615_v1, %v614_v63 }
 0x1ca   :  { %v618_v3 = vadd.f32 1e-14, %v616_v2  ;;  %v617_v8 = vmul.f32 0.1, %v616_v2 }
 0x1cc   :  { %869 = vrcp.f32 %v618_v3 }
 0x1d9   :  { %v870_v5 = vpop.eup %869 }
 0x1da   :  { %v620_v6 = vmul.f32 %v870_v5, %v618_v3 }
 0x1dc   :  { %v621_v7 = vsub.f32 2.0, %v620_v6 }
 0x1de   :  { %v622_v9 = vmul.f32 %v870_v5, %v621_v7 }
 0x1e0   :  { %v623_v10 = vmul.f32 %v622_v9, %v617_v8 }
 0x1e2   :  { %v628_v11 = vadd.f32 1.0, %v623_v10  ;;  %v625_v13 = vmul.f32 %v623_v10, %v993_v15  ;;  %v624_v18 = vmul.f32 %v623_v10, %v998_v17  ;;  %v642_v15 = vpop.permute.xlu1 %641 }
 0x1e4   :  { %871 = vrcp.f32 %v628_v11  ;;  %v627_v19 = vadd.f32 %v625_v13, %v954_v0  ;;  %v626_v22 = vadd.f32 %v624_v18, %v965_v4 }
 0x1e6   :  { %v647_v0 = vpop.permute.xlu1 %646 }
 0x1f1   :  { %v872_v12 = vpop.eup %871 }
 0x1f2   :  { %v630_v14 = vmul.f32 %v872_v12, %v628_v11 }
 0x1f4   :  { %v631_v16 = vsub.f32 2.0, %v630_v14 }
 0x1f6   :  { %v632_v20 = vmul.f32 %v872_v12, %v631_v16 }
 0x1f8   :  { %v634_v21 = vmul.f32 %v632_v20, %v627_v19  ;;  %v633_v23 = vmul.f32 %v632_v20, %v626_v22 }
 0x1fa   :  { %844 = vmatprep.subr.msk.mxu1 %vm46_vm0, %v634_v21 }
 0x1fb   :  { %845 = vmatpush3.msk.msra.mxu1 %vm46_vm0, %v634_v21 }
 0x1fc   :  { %846 = vmatprep.subr.mxu1 %v633_v23 }
 0x1fd   :  { %847 = vmatpush3.msra.mxu1 %v633_v23 }
 0x1fe   :  { %849 = vmatmul.mubr.msk.f32.vlgmr.msra.gmra.mxu1 %vm42_vm1, %v636_v24 }
 0x2be   :  { %v850_v17 = vpop.f32.mrf.mxu1 }
 0x2bf   :  { %v730_v25 = vadd.f32 %v850_v17, %v647_v0 }
 0x2c0   :  { %v724_v4 = vpop.f32.mrf.mxu1 }
 0x2c1   :  { %v734_v26 = vmax.f32 %v730_v25, 0.0  ;;  %v725_v27 = vadd.f32 %v724_v4, %v642_v15 }
 0x2c3   :  { %736 = vst [vmem:[#allocation2 + $0x8] sm:$0x3] %v734_v26  ;;  %v733_v28 = vmax.f32 %v725_v27, 0.0 }
 0x2c5   :  { %735 = vst [vmem:[#allocation2] sm:$0xff] %v733_v28 }
 0x2c6   :  { %884 = shalt.err (!%p881_p4)
}
 0x2c7   :  { %s899_s7 = smov 128   ;;  %s900_s21 = smov 8  }
 0x2c8   :  { %748 = dma.vmem_to_hbm [thread:$0]  %s743_s19, 256, %s1055_s9, [#allocation3], %s899_s7, %s899_s7, %s900_s21  }
 0x2c9   :  { %893 = dma.done.wait [#allocation3], 256  }
 0x2ca   :  { %894 = vsyncadd [#allocation3], 4294967040 }
 0x2cb   :  { %752 = vsyncpa [#allocation3], 1 }

</bundles_post_ra>
